<compile_context>
chip_gen: v7x
topology: tpu7x:2x2x1
jax: 0.10.0
libtpu: 0.0.40
codegen_flags: <defaults>
</compile_context>

<pallas_src>
import functools
import math

import jax
import jax.numpy as jnp
from jax.experimental import pallas as pl
from jax.experimental.pallas import tpu as pltpu


# ---------------------------------------------------------------------------
# Glue: 1-D bilinear interpolation matrix (align_corners=False).
# ---------------------------------------------------------------------------
def _bilinear_matrix(out_size: int, in_size: int, dtype=jnp.float32) -> jnp.ndarray:
    """Returns W of shape (out_size, in_size) s.t. y = W @ x bilinearly resizes."""
    i = jnp.arange(out_size, dtype=jnp.float32)
    src = (i + 0.5) * (float(in_size) / float(out_size)) - 0.5
    # Clamp == PyTorch border handling (weights sum to 1, taps collapse to edge).
    src = jnp.clip(src, 0.0, float(in_size - 1))
    i0 = jnp.floor(src)
    frac = src - i0
    i0 = i0.astype(jnp.int32)
    i1 = jnp.minimum(i0 + 1, in_size - 1)
    cols = jnp.arange(in_size, dtype=jnp.int32)
    w0 = (1.0 - frac)[:, None] * (cols[None, :] == i0[:, None]).astype(jnp.float32)
    w1 = frac[:, None] * (cols[None, :] == i1[:, None]).astype(jnp.float32)
    return (w0 + w1).astype(dtype)


# ---------------------------------------------------------------------------
# Pallas kernel: per (batch, channel-block) slab, two MXU matmuls.
# ---------------------------------------------------------------------------
def _resize_kernel(wh_ref, wwt_ref, x_ref, o_ref, *, new_h, new_w, h_first,
                   compute_dtype):
    CB, H, W = x_ref.shape
    xc = x_ref[...].astype(compute_dtype)                     # (CB, H, W)
    wh = wh_ref[...]                                          # (new_h, H)
    wwt = wwt_ref[...]                                        # (W, new_w) pre-transposed
    # Shared height weights broadcast once per step for the batched matmul.
    whb = jnp.broadcast_to(wh, (CB, new_h, H))

    if h_first:
        # Height resize (batched over channels), f32 accumulate.
        t = jnp.einsum('cnh,chw->cnw', whb, xc,
                       preferred_element_type=jnp.float32)    # (CB, new_h, W)
        # Width resize as one big lane-contracting matmul.
        t = t.astype(compute_dtype).reshape(CB * new_h, W)
        out = jnp.dot(t, wwt, preferred_element_type=jnp.float32)
        out = out.reshape(CB, new_h, new_w)
    else:
        # Width resize first as one big matmul.
        t = jnp.dot(xc.reshape(CB * H, W), wwt,
                    preferred_element_type=jnp.float32)       # (CB*H, new_w)
        t = t.astype(compute_dtype).reshape(CB, H, new_w)
        # Height resize (batched over channels).
        out = jnp.einsum('cnh,chw->cnw', whb, t,
                         preferred_element_type=jnp.float32)  # (CB, new_h, new_w)

    if jnp.issubdtype(o_ref.dtype, jnp.integer):
        out = jnp.round(out)
    o_ref[...] = out.astype(o_ref.dtype)


# ---------------------------------------------------------------------------
# Wrapper.
# ---------------------------------------------------------------------------
def short_side_scale(x: jnp.ndarray, size: int, *,
                     compute_dtype=jnp.float32,
                     vmem_budget_bytes: int = 40 << 20) -> jnp.ndarray:
    """Pallas implementation of ShortSideScale.forward for NCHW input."""
    B, C, H, W = x.shape
    if W < H:
        new_h = int(math.floor(float(H) / W * size))
        new_w = size
    else:
        new_h = size
        new_w = int(math.floor(float(W) / H * size))

    # Pick the cheaper matmul order at trace time (FLOPs per channel).
    cost_h_first = new_h * W * (H + new_w)
    cost_w_first = new_w * H * (W + new_h)
    h_first = cost_h_first <= cost_w_first

    wh = _bilinear_matrix(new_h, H, compute_dtype)                    # (new_h, H)
    wwt = _bilinear_matrix(new_w, W, jnp.float32).T.astype(compute_dtype)  # (W, new_w)

    in_b = jnp.dtype(x.dtype).itemsize
    cd_b = jnp.dtype(compute_dtype).itemsize

    # Fold as many channels as fit the VMEM budget (double-buffered in + out,
    # plus the f32 intermediate).
    cb, need = 1, 0
    for d in range(C, 0, -1):
        if C % d:
            continue
        x_blk = d * H * W * in_b
        o_blk = d * new_h * new_w * in_b
        inter = d * (new_h * W if h_first else H * new_w) * 4
        n = 2 * x_blk + 2 * o_blk + inter
        if n <= vmem_budget_bytes or d == 1:
            cb, need = d, n
            break

    weight_bytes = (wh.size + wwt.size + cb * new_h * H) * cd_b
    vmem_limit = int(min(max(32 << 20, 2 * (need + weight_bytes)), 60 << 20))

    kernel = functools.partial(_resize_kernel, new_h=new_h, new_w=new_w,
                               h_first=h_first, compute_dtype=compute_dtype)

    return pl.pallas_call(
        kernel,
        out_shape=jax.ShapeDtypeStruct((B, C, new_h, new_w), x.dtype),
        grid_spec=pltpu.PrefetchScalarGridSpec(
            num_scalar_prefetch=0,
            grid=(B, C // cb),
            in_specs=[
                pl.BlockSpec((new_h, H), lambda b, c: (0, 0)),        # Wh (shared)
                pl.BlockSpec((W, new_w), lambda b, c: (0, 0)),        # Ww^T (shared)
                pl.BlockSpec((None, cb, H, W), lambda b, c: (b, c, 0, 0)),
            ],
            out_specs=pl.BlockSpec((None, cb, new_h, new_w),
                                   lambda b, c: (b, c, 0, 0)),
        ),
        compiler_params=pltpu.CompilerParams(
            dimension_semantics=("parallel", "parallel"),
            vmem_limit_bytes=vmem_limit),
    )(wh, wwt, x)


# ---------------------------------------------------------------------------
# Pure-JAX gather-based reference (F.interpolate bilinear, align_corners=False).
# ---------------------------------------------------------------------------
def _reference(x, size):
    B, C, H, W = x.shape
    if W < H:
        new_h, new_w = int(math.floor(float(H) / W * size)), size
    else:
        new_h, new_w = size, int(math.floor(float(W) / H * size))

    def taps(out_size, in_size):
        i = jnp.arange(out_size, dtype=jnp.float32)
        src = jnp.clip((i + 0.5) * (in_size / out_size) - 0.5, 0.0, in_size - 1)
        i0 = jnp.floor(src).astype(jnp.int32)
        frac = src - i0.astype(jnp.float32)
        i1 = jnp.minimum(i0 + 1, in_size - 1)
        return i0, i1, frac

    h0, h1, hf = taps(new_h, H)
    w0, w1, wf = taps(new_w, W)
    xf = x.astype(jnp.float32)
    top = xf[:, :, h0, :][:, :, :, w0] * (1 - wf) + xf[:, :, h0, :][:, :, :, w1] * wf
    bot = xf[:, :, h1, :][:, :, :, w0] * (1 - wf) + xf[:, :, h1, :][:, :, :, w1] * wf
    out = top * (1 - hf)[:, None] + bot * hf[:, None]
    return out.astype(x.dtype)


if __name__ == "__main__":
    key = jax.random.PRNGKey(0)
    size = 8

    # Case 1: landscape (H < W)  -> out spatial (8, 12); cheaper order = H-first.
    x1 = jax.random.normal(key, (2, 4, 16, 24), dtype=jnp.float32)
    out1 = jax.block_until_ready(short_side_scale(x1, size))
    ref1 = _reference(x1, size)
    assert out1.shape == (2, 4, 8, 12), out1.shape
    assert jnp.allclose(out1, ref1, atol=1e-5, rtol=1e-5), float(
        jnp.max(jnp.abs(out1 - ref1)))

    # Case 2: portrait (W < H) -> out spatial (12, 8); exercises W-first order.
    x2 = jax.random.normal(jax.random.PRNGKey(1), (2, 4, 24, 16),
                           dtype=jnp.float32)
    out2 = jax.block_until_ready(short_side_scale(x2, size))
    ref2 = _reference(x2, size)
    assert out2.shape == (2, 4, 12, 8), out2.shape
    assert jnp.allclose(out2, ref2, atol=1e-5, rtol=1e-5), float(
        jnp.max(jnp.abs(out2 - ref2)))

    print("KERNEL_OK")
</pallas_src>

<mosaic_0001>
module attributes {stable_mosaic.version = 11 : i64} {
  func.func @_resize_kernel(%arg0: i32, %arg1: i32, %arg2: memref<8x16xf32, #tpu.memory_space<vmem>>, %arg3: memref<24x12xf32, #tpu.memory_space<vmem>>, %arg4: memref<1x4x16x24xf32, #tpu.memory_space<vmem>>, %arg5: memref<1x4x8x12xf32, #tpu.memory_space<vmem>>) attributes {dimension_semantics = [#tpu.dimension_semantics<parallel>, #tpu.dimension_semantics<parallel>], iteration_bounds = array<i64: 2, 1>, scalar_prefetch = 0 : i64, scratch_operands = 0 : i64, tpu.core_type = #tpu.core_type<tc>, window_params = [{pipeline_mode = #tpu.pipeline_mode<synchronous>, transform_indices = @transform_0, window_bounds = array<i64: 8, 16>}, {pipeline_mode = #tpu.pipeline_mode<synchronous>, transform_indices = @transform_1, window_bounds = array<i64: 24, 12>}, {transform_indices = @transform_2, window_bounds = array<i64: 1, 4, 16, 24>}, {transform_indices = @transform_3, window_bounds = array<i64: 1, 4, 8, 12>}]} {
    %c0 = arith.constant 0 : index
    %c0_0 = arith.constant 0 : index
    %c0_1 = arith.constant 0 : index
    %c0_2 = arith.constant 0 : index
    %0 = vector.load %arg4[%c0, %c0_0, %c0_1, %c0_2] : memref<1x4x16x24xf32, #tpu.memory_space<vmem>>, vector<1x4x16x24xf32>
    %1 = vector.shape_cast %0 : vector<1x4x16x24xf32> to vector<4x16x24xf32>
    %c0_3 = arith.constant 0 : index
    %c0_4 = arith.constant 0 : index
    %2 = vector.load %arg2[%c0_3, %c0_4] : memref<8x16xf32, #tpu.memory_space<vmem>>, vector<8x16xf32>
    %c0_5 = arith.constant 0 : index
    %c0_6 = arith.constant 0 : index
    %3 = vector.load %arg3[%c0_5, %c0_6] : memref<24x12xf32, #tpu.memory_space<vmem>>, vector<24x12xf32>
    %4 = vector.shape_cast %2 : vector<8x16xf32> to vector<1x8x16xf32>
    %5 = vector.broadcast %4 : vector<1x8x16xf32> to vector<4x8x16xf32>
    "tpu.trace_start"() <{level = 10 : i32, message = "cnh,chw->cnw"}> : () -> ()
    %cst = arith.constant dense<0.000000e+00> : vector<4x8x24xf32>
    %6 = tpu.matmul %5, %1, %cst {dimension_numbers = #tpu.dot_dimension_numbers<[2], [1], [1], [2], [0, 0, 0, 1, 1, 2], [0], [0]>} : vector<4x8x16xf32>, vector<4x16x24xf32>, vector<4x8x24xf32> -> vector<4x8x24xf32>
    "tpu.trace_stop"() : () -> ()
    %7 = vector.shape_cast %6 : vector<4x8x24xf32> to vector<32x24xf32>
    %cst_7 = arith.constant dense<0.000000e+00> : vector<32x12xf32>
    %8 = tpu.matmul %7, %3, %cst_7 {dimension_numbers = #tpu.dot_dimension_numbers<[1], [0], [0], [1], [0, 0, 1, 1], [], []>} : vector<32x24xf32>, vector<24x12xf32>, vector<32x12xf32> -> vector<32x12xf32>
    %9 = vector.shape_cast %8 : vector<32x12xf32> to vector<4x8x12xf32>
    %c0_8 = arith.constant 0 : index
    %c0_9 = arith.constant 0 : index
    %c0_10 = arith.constant 0 : index
    %c0_11 = arith.constant 0 : index
    %10 = vector.load %arg5[%c0_8, %c0_9, %c0_10, %c0_11] : memref<1x4x8x12xf32, #tpu.memory_space<vmem>>, vector<1x4x8x12xf32>
    %11 = vector.shape_cast %10 : vector<1x4x8x12xf32> to vector<4x8x12xf32>
    %12 = vector.shape_cast %9 : vector<4x8x12xf32> to vector<1x4x8x12xf32>
    tpu.vector_store %arg5[%c0_8, %c0_9, %c0_10, %c0_11], %12 {strides = array<i32>} : memref<1x4x8x12xf32, #tpu.memory_space<vmem>>, vector<1x4x8x12xf32>,
    return
  }
  func.func @transform_0(%arg0: i32, %arg1: i32) -> (i32, i32) {
    %c0_i32 = arith.constant 0 : i32
    %c0_i32_0 = arith.constant 0 : i32
    %c0_i32_1 = arith.constant 0 : i32
    return %c0_i32, %c0_i32_0 : i32, i32
  }
  func.func @transform_1(%arg0: i32, %arg1: i32) -> (i32, i32) {
    %c0_i32 = arith.constant 0 : i32
    %c0_i32_0 = arith.constant 0 : i32
    %c0_i32_1 = arith.constant 0 : i32
    return %c0_i32, %c0_i32_0 : i32, i32
  }
  func.func @transform_2(%arg0: i32, %arg1: i32) -> (i32, i32, i32, i32) {
    %c0_i32 = arith.constant 0 : i32
    %c0_i32_0 = arith.constant 0 : i32
    %c0_i32_1 = arith.constant 0 : i32
    return %arg0, %arg1, %c0_i32, %c0_i32_0 : i32, i32, i32, i32
  }
  func.func @transform_3(%arg0: i32, %arg1: i32) -> (i32, i32, i32, i32) {
    %c0_i32 = arith.constant 0 : i32
    %c0_i32_0 = arith.constant 0 : i32
    %c0_i32_1 = arith.constant 0 : i32
    return %arg0, %arg1, %c0_i32, %c0_i32_0 : i32, i32, i32, i32
  }
}

</mosaic_0001>

<bundles_post_ra>
// kernel: tpu_custom_call.1
= control target key start
LH: loop header
LB: loop body
LE: loop exit
PB: predicated region body
PF: predicated region fallthrough
CT: control target
= control target key end

     0   :  { %8 = vsyncpa [#allocation3], 0  ;;  %s1220_s0 = inlined_call_operand.vmem [shape: f32[8,16], index: 0, kind: input, shape index: {}]   ;;  %s1221_s1 = inlined_call_operand.vmem [shape: f32[24,12], index: 1, kind: input, shape index: {}]   ;;  %s1222_s2 = inlined_call_operand.hbm [shape: f32[2,4,16,24], index: 2, kind: input, shape index: {}]   ;;  %s1223_s3 = inlined_call_operand.hbm [shape: f32[2,4,8,12], index: 3, kind: output, shape index: {}]  }
   0x1   :  { %10 = vsyncpa [#allocation3 + $0x1], 0 }
   0x2   :  { %11 = vsyncpa [#allocation4], 0 }
   0x3   :  { %13 = vsyncpa [#allocation4 + $0x1], 0  ;;  %s1024_s12 = smov 0   ;;  %s1026_s13 = smov 0  }
   0x4   :  { %s1028_s14 = smov 0   ;;  %s1030_s15 = smov 0  }
   0x5   :  { %s1032_s16 = smov 0   ;;  %s1034_s17 = smov 0  }
   0x6 LB: > { %s712_s18 = sadd.s32 4294967295, %s993_s17   ;;  %s713_s19 = sadd.s32 4294967294, %s993_s17   ;;  %s993_s17 = sphi %s1034_s17, %s19_s17   ;;  %s989_s16 = sphi %s1032_s16, %s1238_s16   ;;  %s985_s15 = sphi %s1030_s15, %s1237_s15   ;;  %s981_s14 = sphi %s1028_s14, %s1236_s14   ;;  %s977_s13 = sphi %s1026_s13, %s1235_s13   ;;  %s973_s12 = sphi %s1024_s12, %s1234_s12  }
   0x7   : > { %s31_s20 = sadd.s32 1, %s989_s16  ;;  %s82_s21 = sadd.s32 1, %s981_s14 }
   0x8   : > { %p33_p0 = scmp.ge.s32.totalorder %s31_s20, 2  ;;  %p89_p1 = scmp.ne.s32.totalorder %s981_s14, %s977_s13 }
   0x9   : > { %p90_p2 = scmp.eq.s32.totalorder %s993_s17, 0  ;;  %p95_p3 = scmp.ne.s32.totalorder %s977_s13, %s973_s12 }
   0xa   : > { %s1240_s20 = smov (%p33_p0, %s31_s20), 0  ;;  %p96_p5 = scmp.eq.s32.totalorder %s712_s18, 0 }
   0xb   : > { %p1065_p4 = por %p90_p2, %p89_p1  ;;  %s77_s23 = ssub.s32 %s989_s16, %s1240_s20 }
   0xc   : > { %p121_p6 = scmp.eq.s32.totalorder %s712_s18, 1  ;;  %p80_p7 = scmp.eq.s32.totalorder %s77_s23, 0 }
   0xd   : > { %p1071_p8 = por %p96_p5, %p95_p3  ;;  %p127_p10 = scmp.eq.s32.totalorder %s713_s19, 1 }
   0xe   : > { %p1075_p9 = por %p121_p6, %p89_p1  ;;  %p824_p13 = scmp.lt.s32.totalorder %s993_s17, 2 }
   0xf   : > { %s1080_s26 = scalar_select %p80_p7, %s981_s14, %s82_s21  }
  0x10   : > { %s1227_s25 = scalar_select %p1075_p9, 1, 0 }
  0x11   : > { %p1082_p11 = por %p127_p10, %p95_p3  ;;  %s153_s28 = sand.u32 1, %s981_s14  }
  0x12   : > { %s716_s29 = sshll.u32 %s153_s28, 6  ;;  %s735_s30 = sshll.u32 %s989_s16, 10 }
  0x13   : > { %s1228_s27 = scalar_select %p1082_p11, 1, 0 }
  0x14   : > { %s1093_s6 = scalar_lea.hbm %s1222_s2, %s735_s30  ;;  %s157_s7 = scalar_lea.vmem [#allocation2], %s716_s29 }
  0x15   : > { %s167_s8 = sshll.u32 %s157_s7, 4  ;;  %p1099_p0 = pnand %p824_p13, %p1065_p4  ;;  %s1095_s8 = int_to_ptr.vmem [resolvable:$true] %s167_s8 }
  0x16   : > { %s1104_s10 = scalar_lea.sflag [#allocation3], %s153_s28  ;;  %s881_s11 = scalar_lea.hbm %s1093_s6, 1024 }
  0x17   : > { %p882_p2 = scmp.ne.s32.totalorder %s1093_s6, %s881_s11  ;;  %p883_p3 = pneg %p1099_p0 }
  0x18   : > { %s886_s21 = scalar_lea.hbm %s1222_s2, 2048  ;;  %p887_p4 = scmp.lt.u32.totalorder %s1093_s6, %s1222_s2 }
  0x19   : > { %p884_p5 = pnand %p883_p3, %p882_p2  ;;  %p888_p7 = scmp.lt.u32.totalorder %s886_s21, %s881_s11 }
  0x1a   : > { %p890_p13 = scmp.lt.u32.totalorder %s881_s11, %s1093_s6 }
  0x1b   : > { %p885_p6 = pneg %p884_p5  ;;  %p889_p10 = por %p888_p7, %p887_p4 }
  0x1d   : > { %p891_p12 = por %p890_p13, %p889_p10 }
  0x1f   : > { %p892_p1 = pnand %p891_p12, %p885_p6 }
  0x21   : > { %895 = shalt.err (!%p892_p1)
}
  0x22   : > { %s896_s28 = scalar_lea.vmem %s1095_s8, 1024  ;;  %s995_s29 = smov [#allocation2]  }
  0x23   : > { %p897_p2 = scmp.ne.s32.totalorder %s1095_s8, %s896_s28  ;;  %s901_s30 = sshll.u32 %s995_s29, 4  ;;  %s902_s30 = int_to_ptr.vmem [resolvable:$false] %s901_s30 }
  0x24   : > { %s903_s4 = scalar_lea.vmem %s902_s30, 2048  ;;  %p904_p9 = scmp.lt.s32.totalorder %s1095_s8, %s902_s30 }
  0x25   : > { %p899_p5 = pnand %p897_p2, %p883_p3  ;;  %p905_p4 = scmp.lt.s32.totalorder %s903_s4, %s896_s28 }
  0x27   : > { %p900_p11 = pneg %p899_p5  ;;  %p906_p7 = por %p905_p4, %p904_p9 }
  0x29   : > { %p907_p10 = pnand %p906_p7, %p900_p11 }
  0x2b   : > { %910 = shalt.err (!%p907_p10)
}
  0x2c   : > { %s996_s5 = smov 128   ;;  %s997_s7 = smov 8  }
  0x2d   : > { %819 = dma.hbm_to_vmem [thread:$0]  (!%p1099_p0), %s1093_s6, 1024, %s1095_s8, %s1104_s10, %s996_s5, %s996_s5, %s997_s7  }
  0x2e   : > { %p175_p12 = scmp.lt.s32.totalorder %s993_s17, 3  ;;  %p1230_p1 = scmp.ge.s32.totalorder %s993_s17, 1 }
  0x30   : > { %p176_p3 = pnand %p1230_p1, %p175_p12 }
  0x31   : > { %s1136_s11 = sand.u32 (!%p176_p3), 1, %s977_s13  }
  0x32   : > { %179 = sbr.rel (%p176_p3) target bundleno = 512 (0x200), region = 32  ;;  %s720_s18 = sshll.u32 (!%p176_p3), %s1136_s11, 6 }
  0x33   : > { %s182_s19 = scalar_lea.sflag (!%p176_p3), [#allocation3], %s1136_s11  ;;  %s185_s21 = scalar_lea.vmem (!%p176_p3), [#allocation2], %s720_s18 }
  0x39   : > { %964 = dma.done.wait (%p1071_p8), %s182_s19, 1024  }
  0x3a   : > { %966 = vsyncadd (%p1071_p8), %s182_s19, 4294966272  ;;  %v998_v0 = vmov 0.0|0.0   ;;  %vm999_vm0 = vmmov 0   ;;  %v1000_v1 = vmov 0.0   ;;  %v210_v2 = vld [vmem:[%s185_s21] sm:$0xff]  ;;  %v211_v3 = vld [vmem:[%s185_s21 + $0x8] sm:$0xff] }
  0x3b   : > { %796 = vmatprep.subr.bf16.mxu1 %v998_v0  ;;  %760 = vmatprep.mubr.msk.f32.mxu1 %vm999_vm0, %v1000_v1  ;;  %v797_v4 = vpack.c.bf16 %v211_v3, %v210_v2  ;;  %v212_v5 = vld [vmem:[%s185_s21 + $0x10] sm:$0xff]  ;;  %v213_v6 = vld [vmem:[%s185_s21 + $0x18] sm:$0xff]  ;;  %v214_v7 = vld [vmem:[%s185_s21 + $0x20] sm:$0xff]  ;;  %vm222_vm1 = vcmask 130048   ;;  %vm506_vm2 = vcmask 195584   ;;  %s721_s29 = sshll.u32 %s1136_s11, 5 }
  0x3c   : > { %802 = vmatprep.subr.bf16.mxu0 %v998_v0  ;;  %774 = vmatprep.mubr.msk.f32.mxu0 %vm999_vm0, %v1000_v1  ;;  %v215_v8 = vld [vmem:[%s185_s21 + $0x28] sm:$0xff]  ;;  %v218_v9 = vld [vmem:[%s1220_s0] sm:$0xff]  ;;  %v800_v10 = vpack.c.bf16 %v213_v6, %v212_v5  ;;  %v216_v14 = vld [vmem:[%s185_s21 + $0x30] sm:$0xff]  ;;  %vm604_vm3 = vcmask 97280   ;;  %s207_s30 = scalar_lea.vmem [#allocation5], %s721_s29  ;;  %s736_s5 = sshll.u32 %s985_s15, 9 }
  0x3d   : > { %798 = vmatpush3.bf16.msra.mxu1 %v797_v4  ;;  %v803_v11 = vpack.c.bf16 %v215_v8, %v214_v7  ;;  %v219_v12 = vld [vmem:[%s1221_s1] sm:$0xff]  ;;  %v220_v13 = vld [vmem:[%s1221_s1 + $0x8] sm:$0xff]  ;;  %v217_v15 = vld [vmem:[%s185_s21 + $0x38] sm:$0xff]  ;;  %s625_s4 = sshll.u32 %s207_s30, 4  ;;  %s1171_s19 = scalar_lea.hbm %s1223_s3, %s736_s5  ;;  %s1166_s4 = int_to_ptr.vmem [resolvable:$true] %s625_s4 }
  0x3e   : > { %799 = vmatprep.subr.bf16.mxu1 %v998_v0  ;;  %v808_v16 = vpack.c.bf16 %v220_v13, %v219_v12  ;;  %v806_v17 = vpack.c.bf16 %v217_v15, %v216_v14  ;;  %v221_v18 = vld [vmem:[%s1221_s1 + $0x10] sm:$0xff]  ;;  %s610_s21 = scalar_lea.sflag [#allocation4], %s1136_s11  ;;  %s911_s6 = scalar_lea.vmem %s1166_s4, 512 }
  0x3f   : > { %804 = vmatpush3.bf16.msra.mxu0 %v803_v11  ;;  %p912_p8 = scmp.ne.s32.totalorder %s1166_s4, %s911_s6  ;;  %p1231_p9 = scmp.ne.s32.totalorder %s1227_s25, 0 }
  0x40   : > { %761 = vmatmul.mubr.msk.f32.vlgmr.msra.gmra.mrb[0].mxu1 %vm222_vm1, %v218_v9  ;;  %809 = vmatprep.subr.bf16.mxu0 %v808_v16  ;;  %s1001_s15 = smov [#allocation5]  }
  0x41   : > { %801 = vmatpush3.bf16.msra.mxu1 %v800_v10  ;;  %767 = vmatprep.mubr.msk.f32.mxu1 %vm999_vm0, %v1000_v1  ;;  %p913_p11 = pnand %p912_p8, %p1231_p9  ;;  %s915_s24 = sshll.u32 %s1001_s15, 4  ;;  %s916_s24 = int_to_ptr.vmem [resolvable:$false] %s915_s24 }
  0x42   : > { %805 = vmatprep.subr.bf16.mxu1 %v998_v0  ;;  %775 = vmatmul.mubr.msk.f32.vlgmr.msra.gmra.mrb[0].mxu0 %vm222_vm1, %v218_v9  ;;  %s917_s8 = scalar_lea.vmem %s916_s24, 1024  ;;  %p918_p6 = scmp.lt.s32.totalorder %s1166_s4, %s916_s24 }
  0x43   : > { %811 = vmatpush3.bf16.msra.mxu0 %v808_v16  ;;  %p914_p0 = pneg %p913_p11  ;;  %p919_p13 = scmp.lt.s32.totalorder %s917_s8, %s911_s6 }
  0x44   : > { %768 = vmatmul.mubr.msk.f32.vlgmr.msra.gmra.mrb[2].mxu1 %vm222_vm1, %v218_v9  ;;  %788 = vmatprep.subr.mxu0 %v221_v18 }
  0x45   : > { %807 = vmatpush3.bf16.msra.mxu1 %v806_v17  ;;  %781 = vmatprep.mubr.msk.f32.mxu1 %vm999_vm0, %v1000_v1  ;;  %p920_p2 = por %p919_p13, %p918_p6 }
  0x47   : > { %789 = vmatpush3.msra.mxu0 %v221_v18  ;;  %p921_p5 = pnand %p920_p2, %p914_p0 }
  0x48   : > { %782 = vmatmul.mubr.msk.f32.vlgmr.msra.gmra.mrb[4].mxu1 %vm222_vm1, %v218_v9 }
 0x113   : > { %v292_v19 = vpop.f32.mrb[0].mxu1 }
 0x114   : > { %v762_v20 = vpop.f32.mrb[1].mxu1  ;;  %790 = vmatprep.mubr.msk.f32.mxu0 %vm506_vm2, %v292_v19 }
 0x115   : > { %v432_v21 = vpop.f32.mrb[0].mxu0 }
 0x116   : > { %v776_v22 = vpop.f32.mrb[1].mxu0 }
 0x117   : > { %v362_v23 = vpop.f32.mrb[2].mxu1 }
 0x118   : > { %v769_v24 = vpop.f32.mrb[3].mxu1  ;;  %791 = vmatmul.mubr.msk.f32.vlgmr.msra.gmra.mrb[2].mxu0 %vm506_vm2, %v362_v23 }
 0x119   : > { %793 = vmatprep.mubr.msk.f32.mxu0 %vm506_vm2, %v432_v21 }
 0x11b   : > { %v502_v25 = vpop.f32.mrb[4].mxu1 }
 0x11c   : > { %v783_v26 = vpop.f32.mrb[5].mxu1  ;;  %794 = vmatmul.mubr.msk.f32.gmra.mrb[4].mxu0 %vm506_vm2, %v502_v25 }
 0x1eb   : > { %v792_v27 = vpop.f32.mrb[2].mxu0 }
 0x1ec   : > { %606 = vst.msk [vmem:[%s207_s30 + $0x8] sm:$0xff] %vm604_vm3, %v792_v27  ;;  %v585_v28 = vpop.f32.mrb[3].mxu0 }
 0x1ed   : > { %605 = vst.msk [vmem:[%s207_s30] sm:$0xff] %vm604_vm3, %v585_v28 }
 0x1ef   : > { %v795_v29 = vpop.f32.mrb[4].mxu0 }
 0x1f0   : > { %608 = vst.msk [vmem:[%s207_s30 + $0x18] sm:$0xff] %vm604_vm3, %v795_v29  ;;  %v595_v30 = vpop.f32.mrb[5].mxu0 }
 0x1f1   : > { %607 = vst.msk [vmem:[%s207_s30 + $0x10] sm:$0xff] %vm604_vm3, %v595_v30 }
 0x1f2   : > { %924 = shalt.err (!%p921_p5)
}
 0x1f3   : > { %s925_s9 = scalar_lea.hbm %s1171_s19, 512  ;;  %s929_s23 = scalar_lea.hbm %s1223_s3, 1024 }
 0x1f4   : > { %p926_p4 = scmp.ne.s32.totalorder %s1171_s19, %s925_s9  ;;  %p930_p12 = scmp.lt.u32.totalorder %s1171_s19, %s1223_s3 }
 0x1f5   : > { %p931_p1 = scmp.lt.u32.totalorder %s929_s23, %s925_s9  ;;  %p933_p8 = scmp.lt.u32.totalorder %s925_s9, %s1171_s19 }
 0x1f6   : > { %p927_p7 = pnand %p926_p4, %p1231_p9 }
 0x1f7   : > { %p932_p3 = por %p931_p1, %p930_p12 }
 0x1f8   : > { %p928_p10 = pneg %p927_p7 }
 0x1f9   : > { %p934_p11 = por %p933_p8, %p932_p3 }
 0x1fb   : > { %p935_p0 = pnand %p934_p11, %p928_p10 }
 0x1fd   : > { %938 = shalt.err (!%p935_p0)
}
 0x1fe   : > { %s1002_s30 = smov 128   ;;  %s1003_s5 = smov 8  }
 0x1ff   : > { %814 = dma.vmem_to_hbm [thread:$0]  (%p1231_p9), %s1166_s4, 512, %s1171_s19, %s610_s21, %s1002_s30, %s1002_s30, %s1003_s5  }
 0x200 PF: > { %s640_s7 = sand.u32 1, %s973_s12   ;;  %p1232_p6 = scmp.ne.s32.totalorder %s1228_s27, 0 }
 0x201   : > { %p1233_p13 = scmp.ge.s32.totalorder %s993_s17, 2  ;;  %s641_s18 = scalar_lea.sflag [#allocation4], %s640_s7 }
 0x203   : > { %p821_p2 = pnand %p1233_p13, %p1232_p6 }
 0x205   : > { %968 = dma.done.wait (!%p821_p2), %s641_s18, 512  }
 0x206   : > { %970 = vsyncadd (!%p821_p2), %s641_s18, 4294966784  ;;  %s19_s17 = sadd.s32 1, %s993_s17   ;;  %s1234_s12 = smov %s977_s13 }
 0x207   : > { %p16_p5 = scmp.ge.s32.totalorder %s19_s17, 4   ;;  %s1235_s13 = smov %s981_s14 }
 0x208   : > { %s1236_s14 = smov %s1080_s26  ;;  %s1237_s15 = smov %s989_s16 }
 0x209   : > { %s1238_s16 = smov %s1240_s20  ;;  %18 = sbr.rel (!%p16_p5) target bundleno = 6 (0x6), region = 77 }
 0x210   :  { %646 = vsyncpa [#allocation3], 1 }
 0x211   :  { %648 = vsyncpa [#allocation3 + $0x1], 1 }
 0x212   :  { %649 = vsyncpa [#allocation4], 1 }
 0x213   :  { %651 = vsyncpa [#allocation4 + $0x1], 1 }

</bundles_post_ra>
